<compile_context>
chip_gen: v7x
topology: tpu7x:2x2x1
jax: 0.10.0
libtpu: 0.0.40
codegen_flags: <defaults>
</compile_context>

<pallas_src>
import jax
import jax.numpy as jnp
from jax.experimental import pallas as pl
from jax.experimental.pallas import tpu as pltpu


def _round_up(x, m):
    return (x + m - 1) // m * m


def _pick_tile(dim_pad, unit, t_max):
    """Largest multiple of `unit` that divides dim_pad and is <= t_max."""
    n = dim_pad // unit
    best = 1
    d = 1
    while d * d <= n:
        if n % d == 0:
            for c in (d, n // d):
                if c * unit <= t_max and c > best:
                    best = c
        d += 1
    return best * unit


# ----------------------------------------------------------------------------
# Kernels
# ----------------------------------------------------------------------------
def _head_kernel_single(scale_ref, x_ref, w_ref, b_ref, o_ref):
    """Single contraction step: o = (x @ W_mean + b_mean) / T.  No branches."""
    o_ref[...] = (jnp.dot(x_ref[...], w_ref[...],
                          preferred_element_type=jnp.float32)
                  + b_ref[...]) * scale_ref[0]


def _head_kernel_multi(scale_ref, x_ref, w_ref, b_ref, o_ref):
    """Multi-step contraction.  Grid = (batch tile, class tile, k tile).

    The output BlockSpec is constant over k ('arbitrary' axis), so o_ref stays
    resident in VMEM and doubles as the f32 accumulator.
    """
    k = pl.program_id(2)

    @pl.when(k == 0)
    def _():
        o_ref[...] = jnp.zeros_like(o_ref)

    o_ref[...] += jnp.dot(x_ref[...], w_ref[...],
                          preferred_element_type=jnp.float32)

    # Finalize: bias (already the member-mean) + temperature scaling.
    @pl.when(k == pl.num_programs(2) - 1)
    def _():
        o_ref[...] = (o_ref[...] + b_ref[...]) * scale_ref[0]


# ----------------------------------------------------------------------------
# Wrapper
# ----------------------------------------------------------------------------
def prepare_ensemble_head(member_w, member_b):
    """One-time preprocessing of the member parameters (cacheable).

    member_w: [M, D, K] f32, member_b: [M, K] f32.
    Returns padded bf16 mean-weights / f32 mean-bias ready for the kernel.
    """
    M, D, K = member_w.shape
    D_pad = _round_up(D, 128)
    K_pad = _round_up(K, 128)

    # Averaging logits of linear heads == averaging their parameters.
    w_mean = jnp.mean(member_w, axis=0).astype(jnp.bfloat16)   # [D, K]
    b_mean = jnp.mean(member_b, axis=0).astype(jnp.float32)    # [K]

    if (D_pad, K_pad) == (D, K):
        w_p = w_mean
    else:
        w_p = jnp.zeros((D_pad, K_pad), jnp.bfloat16).at[:D, :K].set(w_mean)
    b_p = jnp.zeros((1, K_pad), jnp.float32).at[0, :K].set(b_mean)
    return {"w": w_p, "b": b_p, "D": D, "K": K}


def base_ensemble_forward(x_nchw, head, temperature,
                          *, tb_max=256, tn_max=512, tk_max=4096):
    """Ensemble forward: mean-of-member logits, temperature scaled.

    x_nchw:      [B, C, H, W]
    head:        output of prepare_ensemble_head (cached across calls)
    temperature: scalar (Python float or traced jnp scalar)
    """
    D, K = head["D"], head["K"]
    w_p, b_p = head["w"], head["b"]
    D_pad, K_pad = w_p.shape

    B = x_nchw.shape[0]
    x_flat = x_nchw.reshape(B, -1)
    assert x_flat.shape[1] == D
    x_bf = x_flat.astype(jnp.bfloat16)

    # Batch padding: multiple of 16 (bf16 vreg holds [16,128] -> full sublanes).
    B_pad = _round_up(B, 16)
    if B_pad <= tb_max:
        tb = B_pad
    else:
        tb = tb_max
        B_pad = _round_up(B, tb)

    tn = _pick_tile(K_pad, 128, tn_max)   # divides K_pad
    tk = _pick_tile(D_pad, 128, tk_max)   # divides D_pad -> no padded k-tiles

    # v7x megacore: if the parallel grid is a single block, split the batch
    # tile (when large enough) so the second TensorCore gets work.
    if (B_pad // tb) * (K_pad // tn) == 1 and tb >= 32 and tb % 32 == 0:
        tb //= 2

    if B_pad == B and D_pad == D:
        x_p = x_bf                                       # no padding copy
    else:
        x_p = jnp.zeros((B_pad, D_pad), jnp.bfloat16).at[:B, :D].set(x_bf)

    # 1/T computed with jnp ops: valid for a learned (traced) temperature.
    scale = jnp.reshape(1.0 / jnp.asarray(temperature, jnp.float32), (1,))

    grid = (B_pad // tb, K_pad // tn, D_pad // tk)
    kernel = _head_kernel_single if grid[2] == 1 else _head_kernel_multi

    # Double-buffered bf16 inputs + f32 bias + resident f32 output tile.
    blk_bytes = 2 * (tb * tk * 2 + tk * tn * 2 + tn * 4) + tb * tn * 4
    vmem_limit = int(min(max(2 * blk_bytes, 32 * 1024 * 1024),
                         48 * 1024 * 1024))

    out_padded = pl.pallas_call(
        kernel,
        out_shape=jax.ShapeDtypeStruct((B_pad, K_pad), jnp.float32),
        grid=grid,
        in_specs=[
            pl.BlockSpec(memory_space=pltpu.MemorySpace.SMEM),     # 1/T scalar
            pl.BlockSpec((tb, tk), lambda i, j, k: (i, k)),        # features
            pl.BlockSpec((tk, tn), lambda i, j, k: (k, j)),        # mean weights
            pl.BlockSpec((1, tn), lambda i, j, k: (0, j)),         # mean bias
        ],
        out_specs=pl.BlockSpec((tb, tn), lambda i, j, k: (i, j)),  # lane-dense acc
        compiler_params=pltpu.CompilerParams(
            dimension_semantics=("parallel", "parallel", "arbitrary"),
            vmem_limit_bytes=vmem_limit),
    )(scale, x_p, w_p, b_p)

    return out_padded[:B, :K]


# TODO(synk): file/checkpoint plumbing (load_algorithms, load_state, save_state),
# optimizers, DDP and GradScaler have no Pallas equivalent and are omitted.
# TODO(synk): training path (member weights changing per step) would instead
# fuse the member mean into the kernel via an extra 'm' contraction axis.


if __name__ == "__main__":
    key = jax.random.PRNGKey(0)
    kx, kw, kb = jax.random.split(key, 3)

    # Small shapes consistent with an image-classifier ensemble.
    B, C, H, W = 2, 4, 16, 16
    num_classes = 10
    num_members = 3          # len(self.paths)
    D = C * H * W

    x = jax.random.normal(kx, (B, C, H, W), dtype=jnp.float32)
    # Deterministic synthetic member parameters (stand in for trained algorithms).
    member_w = jax.random.normal(kw, (num_members, D, num_classes),
                                 dtype=jnp.float32) * 0.02
    member_b = jax.random.normal(kb, (num_members, num_classes),
                                 dtype=jnp.float32) * 0.1

    # Temperature: 'initial' -> 1.0; exercise a non-trivial value to cover
    # the scaling path.
    temperature = 1.5

    # Weight preprocessing done once (cacheable across forward calls).
    head = prepare_ensemble_head(member_w, member_b)

    # Pure-JAX reference (original formulation: mean of member logits / T).
    xf = x.reshape(B, -1)
    ref = jnp.mean(jnp.einsum("bd,mdk->mbk", xf, member_w)
                   + member_b[:, None, :], axis=0) / temperature

    # 1) Default path: contraction axis collapsed -> single-step kernel.
    out = jax.block_until_ready(base_ensemble_forward(x, head, temperature))
    assert out.shape == (B, num_classes)
    err = float(jnp.max(jnp.abs(out - ref)))
    assert jnp.allclose(out, ref, atol=2e-2, rtol=2e-2), \
        f"single-step mismatch vs reference (max abs err {err})"

    # 2) Force a multi-step contraction (tk < D) to exercise the accumulator path.
    out2 = jax.block_until_ready(
        base_ensemble_forward(x, head, temperature, tk_max=512))
    err2 = float(jnp.max(jnp.abs(out2 - ref)))
    assert jnp.allclose(out2, ref, atol=2e-2, rtol=2e-2), \
        f"multi-step mismatch vs reference (max abs err {err2})"

    print("KERNEL_OK")
</pallas_src>

<mosaic_0001>
module attributes {stable_mosaic.version = 11 : i64} {
  func.func @_head_kernel_single(%arg0: i32, %arg1: i32, %arg2: i32, %arg3: memref<1xf32, #tpu.memory_space<smem>>, %arg4: memref<16x1024xbf16, #tpu.memory_space<vmem>>, %arg5: memref<1024x128xbf16, #tpu.memory_space<vmem>>, %arg6: memref<1x128xf32, #tpu.memory_space<vmem>>, %arg7: memref<16x128xf32, #tpu.memory_space<vmem>>) attributes {dimension_semantics = [#tpu.dimension_semantics<parallel>, #tpu.dimension_semantics<parallel>, #tpu.dimension_semantics<arbitrary>], iteration_bounds = array<i64: 1, 1, 1>, scalar_prefetch = 0 : i64, scratch_operands = 0 : i64, tpu.core_type = #tpu.core_type<tc>, window_params = [{transform_indices = @transform_0, window_bounds = array<i64: 1>}, {transform_indices = @transform_1, window_bounds = array<i64: 16, 1024>}, {transform_indices = @transform_2, window_bounds = array<i64: 1024, 128>}, {transform_indices = @transform_3, window_bounds = array<i64: 1, 128>}, {transform_indices = @transform_4, window_bounds = array<i64: 16, 128>}]} {
    %c0 = arith.constant 0 : index
    %c0_0 = arith.constant 0 : index
    %0 = vector.load %arg4[%c0, %c0_0] : memref<16x1024xbf16, #tpu.memory_space<vmem>>, vector<16x1024xbf16>
    %c0_1 = arith.constant 0 : index
    %c0_2 = arith.constant 0 : index
    %1 = vector.load %arg5[%c0_1, %c0_2] : memref<1024x128xbf16, #tpu.memory_space<vmem>>, vector<1024x128xbf16>
    %cst = arith.constant dense<0.000000e+00> : vector<16x128xf32>
    %2 = tpu.matmul %0, %1, %cst {dimension_numbers = #tpu.dot_dimension_numbers<[1], [0], [0], [1], [0, 0, 1, 1], [], []>} : vector<16x1024xbf16>, vector<1024x128xbf16>, vector<16x128xf32> -> vector<16x128xf32>
    %c0_3 = arith.constant 0 : index
    %c0_4 = arith.constant 0 : index
    %3 = vector.load %arg6[%c0_3, %c0_4] : memref<1x128xf32, #tpu.memory_space<vmem>>, vector<1x128xf32>
    %4 = vector.broadcast %3 : vector<1x128xf32> to vector<16x128xf32>
    %5 = arith.addf %2, %4 : vector<16x128xf32>
    %c0_5 = arith.constant 0 : index
    %6 = memref.load %arg3[%c0_5] : memref<1xf32, #tpu.memory_space<smem>>
    %7 = vector.broadcast %6 : f32 to vector<16x128xf32>
    %8 = arith.mulf %5, %7 : vector<16x128xf32>
    %c0_6 = arith.constant 0 : index
    %c0_7 = arith.constant 0 : index
    %9 = vector.load %arg7[%c0_6, %c0_7] : memref<16x128xf32, #tpu.memory_space<vmem>>, vector<16x128xf32>
    tpu.vector_store %arg7[%c0_6, %c0_7], %8 {strides = array<i32>} : memref<16x128xf32, #tpu.memory_space<vmem>>, vector<16x128xf32>,
    return
  }
  func.func @transform_0(%arg0: i32, %arg1: i32, %arg2: i32) -> i32 {
    %c0_i32 = arith.constant 0 : i32
    %c0_i32_0 = arith.constant 0 : i32
    return %c0_i32 : i32
  }
  func.func @transform_1(%arg0: i32, %arg1: i32, %arg2: i32) -> (i32, i32) {
    %c0_i32 = arith.constant 0 : i32
    return %arg0, %arg2 : i32, i32
  }
  func.func @transform_2(%arg0: i32, %arg1: i32, %arg2: i32) -> (i32, i32) {
    %c0_i32 = arith.constant 0 : i32
    return %arg2, %arg1 : i32, i32
  }
  func.func @transform_3(%arg0: i32, %arg1: i32, %arg2: i32) -> (i32, i32) {
    %c0_i32 = arith.constant 0 : i32
    %c0_i32_0 = arith.constant 0 : i32
    return %c0_i32, %arg1 : i32, i32
  }
  func.func @transform_4(%arg0: i32, %arg1: i32, %arg2: i32) -> (i32, i32) {
    %c0_i32 = arith.constant 0 : i32
    return %arg0, %arg1 : i32, i32
  }
}

</mosaic_0001>

<bundles_post_ra>
// kernel: tpu_custom_call.1
= control target key start
LH: loop header
LB: loop body
LE: loop exit
PB: predicated region body
PF: predicated region fallthrough
CT: control target
= control target key end

     0   :  { %10 = vsyncpa [#allocation4], 0  ;;  %s1185_s0 = inlined_call_operand.<no memory space> [shape: f32[1], index: 0, kind: input, shape index: {}]   ;;  %s1186_s1 = inlined_call_operand.hbm [shape: bf16[16,1024], index: 1, kind: input, shape index: {}]   ;;  %s1187_s2 = inlined_call_operand.hbm [shape: bf16[1024,128], index: 2, kind: input, shape index: {}]   ;;  %s1188_s3 = inlined_call_operand.vmem [shape: f32[1,128], index: 3, kind: input, shape index: {}]   ;;  %s1189_s4 = inlined_call_operand.hbm [shape: f32[16,128], index: 4, kind: output, shape index: {}]  }
   0x1   :  { %11 = vsyncpa [#allocation7], 0 }
   0x2   :  { %12 = vsyncpa [#allocation5], 0  ;;  %s1109_s15 = smov [#allocation3]   ;;  %s1037_s19 = scalar_lea.hbm %s1186_s1, 1024 }
   0x3   :  { %s20_s16 = sshll.u32 %s1109_s15, 4  ;;  %p1038_p0 = scmp.ne.s32.totalorder %s1186_s1, %s1037_s19  ;;  %s21_s16 = int_to_ptr.vmem [resolvable:$true] %s20_s16 }
   0x4   :  { %p1041_p1 = scmp.lt.u32.totalorder %s1037_s19, %s1186_s1 }
   0x6   :  { %p1043_p2 = pnand %p1041_p1, %p1038_p0 }
   0x8   :  { %1046 = shalt.err (!%p1043_p2)
}
   0x9   :  { %s1047_s24 = scalar_lea.vmem %s21_s16, 1024  ;;  %p1052_p4 = scmp.lt.s32.totalorder %s21_s16, %s21_s16 }
   0xa   :  { %p1048_p3 = scmp.ne.s32.totalorder %s21_s16, %s1047_s24  ;;  %p1053_p5 = scmp.lt.s32.totalorder %s1047_s24, %s1047_s24 }
   0xc   :  { %p1054_p6 = por %p1053_p5, %p1052_p4 }
   0xe   :  { %p1055_p7 = pnand %p1054_p6, %p1048_p3 }
  0x10   :  { %1058 = shalt.err (!%p1055_p7)
}
  0x11   :  { %s1110_s25 = smov 512   ;;  %s1111_s26 = smov 32  }
  0x12   :  { %26 = dma.hbm_to_vmem [thread:$0]  %s1186_s1, 1024, %s21_s16, [#allocation4], %s1110_s25, %s1110_s25, %s1111_s26  }
  0x13   :  { %s1112_s29 = smov [#allocation6]   ;;  %s1059_s7 = scalar_lea.hbm %s1187_s2, 8192 }
  0x14   :  { %s32_s30 = sshll.u32 %s1112_s29, 4  ;;  %p1060_p8 = scmp.ne.s32.totalorder %s1187_s2, %s1059_s7  ;;  %s33_s30 = int_to_ptr.vmem [resolvable:$true] %s32_s30 }
  0x15   :  { %p1063_p9 = scmp.lt.u32.totalorder %s1059_s7, %s1187_s2 }
  0x17   :  { %p1065_p10 = pnand %p1063_p9, %p1060_p8 }
  0x19   :  { %1068 = shalt.err (!%p1065_p10)
}
  0x1a   :  { %s1069_s12 = scalar_lea.vmem %s33_s30, 8192  ;;  %p1074_p12 = scmp.lt.s32.totalorder %s33_s30, %s33_s30 }
  0x1b   :  { %p1070_p11 = scmp.ne.s32.totalorder %s33_s30, %s1069_s12  ;;  %p1075_p13 = scmp.lt.s32.totalorder %s1069_s12, %s1069_s12 }
  0x1d   :  { %p1076_p0 = por %p1075_p13, %p1074_p12 }
  0x1f   :  { %p1077_p1 = pnand %p1076_p0, %p1070_p11 }
  0x21   :  { %1080 = shalt.err (!%p1077_p1)
}
  0x22   :  { %s1113_s1 = smov 64   ;;  %s1114_s13 = smov 4  }
  0x23   :  { %38 = dma.hbm_to_vmem [thread:$0]  %s1187_s2, 8192, %s33_s30, [#allocation7], %s1113_s1, %s1113_s1, %s1114_s13  }
  0x24   :  { %1103 = dma.done.wait [#allocation4], 1024  }
  0x25   :  { %1104 = vsyncadd [#allocation4], 4294966272 }
  0x26   :  { %1105 = dma.done.wait [#allocation7], 8192  }
  0x27   :  { %1106 = vsyncadd [#allocation7], 4294959104  ;;  %v973_v0 = vld [vmem:[#allocation6 + $0x40] sm:$0xff]   ;;  %v977_v4 = vld [vmem:[#allocation6 + $0x48] sm:$0xff]   ;;  %s1115_s18 = smov [#allocation8]  }
  0x28   :  { %v974_v1 = vld [vmem:[#allocation6 + $0xc0] sm:$0xff]   ;;  %876 = vmatprep.subr.bf16.mxu0 %v973_v0  ;;  %v978_v5 = vld [vmem:[#allocation6 + $0xc8] sm:$0xff]   ;;  %v981_v8 = vld [vmem:[#allocation6 + $0x50] sm:$0xff]   ;;  %s790_s19 = sshll.u32 %s1115_s18, 4  ;;  %s791_s19 = int_to_ptr.vmem [resolvable:$true] %s790_s19 }
  0x29   :  { %v975_v2 = vld [vmem:[#allocation6] sm:$0xff]   ;;  %898 = vmatprep.subr.bf16.mxu1 %v974_v1  ;;  %v979_v6 = vld [vmem:[#allocation6 + $0x8] sm:$0xff]   ;;  %v982_v9 = vld [vmem:[#allocation6 + $0xd0] sm:$0xff]   ;;  %s1081_s20 = scalar_lea.vmem %s791_s19, 256  ;;  %p1086_p3 = scmp.lt.s32.totalorder %s791_s19, %s791_s19 }
  0x2a   :  { %v976_v3 = vld [vmem:[#allocation6 + $0x80] sm:$0xff]   ;;  %877 = vmatpush3.bf16.msra.mxu0 %v975_v2  ;;  %v980_v7 = vld [vmem:[#allocation6 + $0x88] sm:$0xff]   ;;  %v983_v10 = vld [vmem:[#allocation6 + $0x10] sm:$0xff]   ;;  %p1082_p2 = scmp.ne.s32.totalorder %s791_s19, %s1081_s20  ;;  %p1087_p4 = scmp.lt.s32.totalorder %s1081_s20, %s1081_s20 }
  0x2b   :  { %899 = vmatpush3.bf16.msra.mxu1 %v976_v3  ;;  %878 = vmatprep.subr.bf16.mxu0 %v977_v4  ;;  %v984_v11 = vld [vmem:[#allocation6 + $0x90] sm:$0xff]   ;;  %v985_v12 = vld [vmem:[#allocation6 + $0x58] sm:$0xff]   ;;  %v989_v16 = vld [vmem:[#allocation6 + $0x60] sm:$0xff]  }
  0x2c   :  { %900 = vmatprep.subr.bf16.mxu1 %v978_v5  ;;  %v986_v13 = vld [vmem:[#allocation6 + $0xd8] sm:$0xff]   ;;  %v990_v17 = vld [vmem:[#allocation6 + $0xe0] sm:$0xff]   ;;  %v993_v20 = vld [vmem:[#allocation6 + $0x68] sm:$0xff]   ;;  %p1088_p5 = por %p1087_p4, %p1086_p3 }
  0x2d   :  { %v987_v14 = vld [vmem:[#allocation6 + $0x18] sm:$0xff]   ;;  %v991_v18 = vld [vmem:[#allocation6 + $0x20] sm:$0xff]   ;;  %v994_v21 = vld [vmem:[#allocation6 + $0xe8] sm:$0xff]  }
  0x2e   :  { %879 = vmatpush3.bf16.msra.mxu0 %v979_v6  ;;  %v988_v15 = vld [vmem:[#allocation6 + $0x98] sm:$0xff]   ;;  %v992_v19 = vld [vmem:[#allocation6 + $0xa0] sm:$0xff]   ;;  %v995_v22 = vld [vmem:[#allocation6 + $0x28] sm:$0xff]   ;;  %p1089_p6 = pnand %p1088_p5, %p1082_p2 }
  0x2f   :  { %901 = vmatpush3.bf16.msra.mxu1 %v980_v7  ;;  %880 = vmatprep.subr.bf16.mxu0 %v981_v8  ;;  %v996_v23 = vld [vmem:[#allocation6 + $0xa8] sm:$0xff]   ;;  %v997_v24 = vld [vmem:[#allocation6 + $0x70] sm:$0xff]   ;;  %v1001_v28 = vld [vmem:[#allocation6 + $0x78] sm:$0xff]  }
  0x30   :  { %902 = vmatprep.subr.bf16.mxu1 %v982_v9  ;;  %v998_v25 = vld [vmem:[#allocation6 + $0xf0] sm:$0xff]   ;;  %v1002_v29 = vld [vmem:[#allocation6 + $0xf8] sm:$0xff]   ;;  %v48_v32 = vld [vmem:[#allocation3] sm:$0xff] }
  0x31   :  { %v999_v26 = vld [vmem:[#allocation6 + $0x30] sm:$0xff]   ;;  %v1003_v30 = vld [vmem:[#allocation6 + $0x38] sm:$0xff]   ;;  %v52_v33 = vld [vmem:[#allocation3 + $0x20] sm:$0xff] }
  0x32   :  { %881 = vmatpush3.bf16.msra.mxu0 %v983_v10  ;;  %v1000_v27 = vld [vmem:[#allocation6 + $0xb0] sm:$0xff]   ;;  %v1004_v31 = vld [vmem:[#allocation6 + $0xb8] sm:$0xff]   ;;  %v49_v34 = vld [vmem:[#allocation3 + $0x8] sm:$0xff]  ;;  %v804_v35 = vcombine.low %v48_v32, %v52_v33  ;;  %v805_v36 = vcombine.high %v48_v32, %v52_v33 }
  0x33   :  { %903 = vmatpush3.bf16.msra.mxu1 %v984_v11  ;;  %882 = vmatprep.subr.bf16.mxu0 %v985_v12  ;;  %v53_v37 = vld [vmem:[#allocation3 + $0x28] sm:$0xff]  ;;  %v1005_v40 = vld [vmem:[#allocation6 + $0x140] sm:$0xff]   ;;  %v1013_v48 = vld [vmem:[#allocation6 + $0x150] sm:$0xff]  }
  0x34   :  { %904 = vmatprep.subr.bf16.mxu1 %v986_v13  ;;  %v806_v38 = vcombine.low %v49_v34, %v53_v37  ;;  %v807_v39 = vcombine.high %v49_v34, %v53_v37  ;;  %647 = vmatprep.mubr.bf16.mxu0 %v805_v36  ;;  %v1006_v41 = vld [vmem:[#allocation6 + $0x1c0] sm:$0xff]   ;;  %v1009_v44 = vld [vmem:[#allocation6 + $0x148] sm:$0xff]   ;;  %v1014_v49 = vld [vmem:[#allocation6 + $0x1d0] sm:$0xff]  }
  0x35   :  { %v1007_v42 = vld [vmem:[#allocation6 + $0x100] sm:$0xff]   ;;  %v1010_v45 = vld [vmem:[#allocation6 + $0x1c8] sm:$0xff]   ;;  %v1015_v50 = vld [vmem:[#allocation6 + $0x110] sm:$0xff]  }
  0x36   :  { %883 = vmatpush3.bf16.msra.mxu0 %v987_v14  ;;  %688 = vmatprep.mubr.bf16.mxu1 %v807_v39  ;;  %v1008_v43 = vld [vmem:[#allocation6 + $0x180] sm:$0xff]   ;;  %v1011_v46 = vld [vmem:[#allocation6 + $0x108] sm:$0xff]   ;;  %v1016_v51 = vld [vmem:[#allocation6 + $0x190] sm:$0xff]  }
  0x37   :  { %905 = vmatpush3.bf16.msra.mxu1 %v988_v15  ;;  %884 = vmatprep.subr.bf16.mxu0 %v989_v16  ;;  %v1012_v47 = vld [vmem:[#allocation6 + $0x188] sm:$0xff]   ;;  %v1017_v52 = vld [vmem:[#allocation6 + $0x158] sm:$0xff]   ;;  %v1021_v56 = vld [vmem:[#allocation6 + $0x160] sm:$0xff]  }
  0x38   :  { %906 = vmatprep.subr.bf16.mxu1 %v990_v17  ;;  %v1018_v53 = vld [vmem:[#allocation6 + $0x1d8] sm:$0xff]   ;;  %v1022_v57 = vld [vmem:[#allocation6 + $0x1e0] sm:$0xff]   ;;  %v1025_v60 = vld [vmem:[#allocation6 + $0x168] sm:$0xff]  }
  0x39   :  { %v1019_v54 = vld [vmem:[#allocation6 + $0x118] sm:$0xff]   ;;  %v1023_v58 = vld [vmem:[#allocation6 + $0x120] sm:$0xff]   ;;  %v1026_v61 = vld [vmem:[#allocation6 + $0x1e8] sm:$0xff]  }
  0x3a   :  { %885 = vmatpush3.bf16.msra.mxu0 %v991_v18  ;;  %v1020_v55 = vld [vmem:[#allocation6 + $0x198] sm:$0xff]   ;;  %v1024_v59 = vld [vmem:[#allocation6 + $0x1a0] sm:$0xff]   ;;  %v1027_v62 = vld [vmem:[#allocation6 + $0x128] sm:$0xff]  }
  0x3b   :  { %907 = vmatpush3.bf16.msra.mxu1 %v992_v19  ;;  %886 = vmatprep.subr.bf16.mxu0 %v993_v20  ;;  %v1028_v63 = vld [vmem:[#allocation6 + $0x1a8] sm:$0xff]   ;;  %v1029_v0 = vld [vmem:[#allocation6 + $0x170] sm:$0xff]   ;;  %v1033_v4 = vld [vmem:[#allocation6 + $0x178] sm:$0xff]  }
  0x3c   :  { %908 = vmatprep.subr.bf16.mxu1 %v994_v21  ;;  %v1030_v1 = vld [vmem:[#allocation6 + $0x1f0] sm:$0xff]   ;;  %v1034_v5 = vld [vmem:[#allocation6 + $0x1f8] sm:$0xff]   ;;  %v803_v18 = vld [vmem:[%s1188_s3] ss:$0 sm:$0xff] }
  0x3d   :  { %v1031_v2 = vld [vmem:[#allocation6 + $0x130] sm:$0xff]   ;;  %v1035_v6 = vld [vmem:[#allocation6 + $0x138] sm:$0xff]  }
  0x3e   :  { %887 = vmatpush3.bf16.msra.mxu0 %v995_v22  ;;  %v1032_v3 = vld [vmem:[#allocation6 + $0x1b0] sm:$0xff]   ;;  %v1036_v7 = vld [vmem:[#allocation6 + $0x1b8] sm:$0xff]  }
  0x3f   :  { %909 = vmatpush3.bf16.msra.mxu1 %v996_v23  ;;  %888 = vmatprep.subr.bf16.mxu0 %v997_v24  ;;  %v50_v8 = vld [vmem:[#allocation3 + $0x10] sm:$0xff]  ;;  %v51_v12 = vld [vmem:[#allocation3 + $0x18] sm:$0xff] }
  0x40   :  { %910 = vmatprep.subr.bf16.mxu1 %v998_v25  ;;  %v54_v9 = vld [vmem:[#allocation3 + $0x30] sm:$0xff]  ;;  %v55_v13 = vld [vmem:[#allocation3 + $0x38] sm:$0xff] }
  0x41   :  { %v808_v10 = vcombine.low %v50_v8, %v54_v9  ;;  %v809_v11 = vcombine.high %v50_v8, %v54_v9  ;;  %v810_v14 = vcombine.low %v51_v12, %v55_v13  ;;  %v811_v15 = vcombine.high %v51_v12, %v55_v13 }
  0x42   :  { %889 = vmatpush3.bf16.msra.mxu0 %v999_v26 }
  0x43   :  { %911 = vmatpush3.bf16.msra.mxu1 %v1000_v27  ;;  %890 = vmatprep.subr.bf16.mxu0 %v1001_v28 }
  0x44   :  { %912 = vmatprep.subr.bf16.mxu1 %v1002_v29 }
  0x46   :  { %891 = vmatpush3.bf16.msra.mxu0 %v1003_v30 }
  0x47   :  { %913 = vmatpush3.bf16.msra.mxu1 %v1004_v31  ;;  %920 = vmatprep.subr.bf16.mxu0 %v1005_v40 }
  0x48   :  { %942 = vmatprep.subr.bf16.mxu1 %v1006_v41 }
  0x49   :  { %648 = vmatmul.mubr.bf16.vlgmr.msra.gmra.mrb[0].mxu0 %v804_v35 }
  0x4a   :  { %689 = vmatmul.mubr.bf16.vlgmr.msra.gmra.mrb[0].mxu1 %v806_v38  ;;  %921 = vmatpush3.bf16.msra.mxu0 %v1007_v42 }
  0x4b   :  { %943 = vmatpush3.bf16.msra.mxu1 %v1008_v43  ;;  %922 = vmatprep.subr.bf16.mxu0 %v1009_v44 }
  0x4c   :  { %944 = vmatprep.subr.bf16.mxu1 %v1010_v45  ;;  %729 = vmatprep.mubr.bf16.mxu0 %v809_v11  ;;  %v780_v45 = vstv %s1185_s0 }
  0x4d   :  { %770 = vmatprep.mubr.bf16.mxu1 %v811_v15 }
  0x4e   :  { %923 = vmatpush3.bf16.msra.mxu0 %v1011_v46 }
  0x4f   :  { %945 = vmatpush3.bf16.msra.mxu1 %v1012_v47  ;;  %924 = vmatprep.subr.bf16.mxu0 %v1013_v48 }
  0x50   :  { %946 = vmatprep.subr.bf16.mxu1 %v1014_v49 }
  0x52   :  { %925 = vmatpush3.bf16.msra.mxu0 %v1015_v50 }
  0x53   :  { %947 = vmatpush3.bf16.msra.mxu1 %v1016_v51  ;;  %926 = vmatprep.subr.bf16.mxu0 %v1017_v52 }
  0x54   :  { %948 = vmatprep.subr.bf16.mxu1 %v1018_v53 }
  0x56   :  { %927 = vmatpush3.bf16.msra.mxu0 %v1019_v54 }
  0x57   :  { %949 = vmatpush3.bf16.msra.mxu1 %v1020_v55  ;;  %928 = vmatprep.subr.bf16.mxu0 %v1021_v56 }
  0x58   :  { %950 = vmatprep.subr.bf16.mxu1 %v1022_v57 }
  0x5a   :  { %929 = vmatpush3.bf16.msra.mxu0 %v1023_v58 }
  0x5b   :  { %951 = vmatpush3.bf16.msra.mxu1 %v1024_v59  ;;  %930 = vmatprep.subr.bf16.mxu0 %v1025_v60 }
  0x5c   :  { %952 = vmatprep.subr.bf16.mxu1 %v1026_v61 }
  0x5e   :  { %931 = vmatpush3.bf16.msra.mxu0 %v1027_v62 }
  0x5f   :  { %953 = vmatpush3.bf16.msra.mxu1 %v1028_v63  ;;  %932 = vmatprep.subr.bf16.mxu0 %v1029_v0 }
  0x60   :  { %954 = vmatprep.subr.bf16.mxu1 %v1030_v1 }
  0x62   :  { %933 = vmatpush3.bf16.msra.mxu0 %v1031_v2 }
  0x63   :  { %955 = vmatpush3.bf16.msra.mxu1 %v1032_v3  ;;  %934 = vmatprep.subr.bf16.mxu0 %v1033_v4 }
  0x64   :  { %956 = vmatprep.subr.bf16.mxu1 %v1034_v5 }
  0x66   :  { %935 = vmatpush3.bf16.msra.mxu0 %v1035_v6 }
  0x67   :  { %957 = vmatpush3.bf16.msra.mxu1 %v1036_v7 }
  0x69   :  { %730 = vmatmul.mubr.bf16.vlgmr.msra.gmra.mrb[4].mxu0 %v808_v10 }
  0x6a   :  { %771 = vmatmul.mubr.bf16.vlgmr.msra.gmra.mrb[4].mxu1 %v810_v14 }
 0x11c   :  { %v892_v16 = vpop.f32.mrb[0].mxu0 }
 0x11d   :  { %v914_v17 = vpop.f32.mrb[0].mxu1  ;;  %v893_v19 = vpop.f32.mrb[1].mxu0 }
 0x11e   :  { %v894_v20 = vadd.f32 %v893_v19, %v892_v16  ;;  %v915_v21 = vpop.f32.mrb[1].mxu1  ;;  %v895_v22 = vpop.f32.mrb[2].mxu0 }
 0x11f   :  { %v916_v23 = vadd.f32 %v915_v21, %v914_v17  ;;  %v917_v24 = vpop.f32.mrb[2].mxu1  ;;  %v896_v25 = vpop.f32.mrb[3].mxu0 }
 0x120   :  { %v650_v26 = vadd.f32 %v894_v20, %v803_v18  ;;  %v897_v27 = vadd.f32 %v896_v25, %v895_v22  ;;  %v918_v28 = vpop.f32.mrb[3].mxu1 }
 0x121   :  { %v919_v29 = vadd.f32 %v918_v28, %v917_v24 }
 0x122   :  { %v691_v30 = vadd.f32 %v916_v23, %v650_v26  ;;  %v653_v31 = vadd.f32 %v897_v27, %v803_v18 }
 0x124   :  { %v694_v32 = vadd.f32 %v919_v29, %v653_v31 }
 0x13c   :  { %v936_v33 = vpop.f32.mrb[4].mxu0 }
 0x13d   :  { %v958_v34 = vpop.f32.mrb[4].mxu1  ;;  %v937_v35 = vpop.f32.mrb[5].mxu0 }
 0x13e   :  { %v938_v36 = vadd.f32 %v937_v35, %v936_v33  ;;  %v959_v37 = vpop.f32.mrb[5].mxu1  ;;  %v939_v38 = vpop.f32.mrb[6].mxu0 }
 0x13f   :  { %v960_v39 = vadd.f32 %v959_v37, %v958_v34  ;;  %v961_v40 = vpop.f32.mrb[6].mxu1  ;;  %v940_v41 = vpop.f32.mrb[7].mxu0 }
 0x140   :  { %v732_v42 = vadd.f32 %v938_v36, %v691_v30  ;;  %v941_v43 = vadd.f32 %v940_v41, %v939_v38  ;;  %v962_v44 = vpop.f32.mrb[7].mxu1 }
 0x141   :  { %v963_v46 = vadd.f32 %v962_v44, %v961_v40 }
 0x142   :  { %v773_v47 = vadd.f32 %v960_v39, %v732_v42  ;;  %v735_v48 = vadd.f32 %v941_v43, %v694_v32 }
 0x144   :  { %v781_v49 = vmul.f32 %v780_v45, %v773_v47  ;;  %v776_v50 = vadd.f32 %v963_v46, %v735_v48 }
 0x146   :  { %783 = vst [vmem:[#allocation8] sm:$0xff] %v781_v49  ;;  %v782_v51 = vmul.f32 %v780_v45, %v776_v50 }
 0x148   :  { %784 = vst [vmem:[#allocation8 + $0x8] sm:$0xff] %v782_v51 }
 0x149   :  { %1092 = shalt.err (!%p1089_p6)
}
 0x14a   :  { %s1093_s22 = scalar_lea.hbm %s1189_s4, 256 }
 0x14b   :  { %p1094_p7 = scmp.ne.s32.totalorder %s1189_s4, %s1093_s22  ;;  %p1097_p8 = scmp.lt.u32.totalorder %s1093_s22, %s1189_s4 }
 0x14d   :  { %p1099_p9 = pnand %p1097_p8, %p1094_p7 }
 0x14f   :  { %1102 = shalt.err (!%p1099_p9)
}
 0x150   :  { %s1116_s27 = smov 128   ;;  %s1117_s28 = smov 8  }
 0x151   :  { %796 = dma.vmem_to_hbm [thread:$0]  %s791_s19, 256, %s1189_s4, [#allocation5], %s1116_s27, %s1116_s27, %s1117_s28  }
 0x152   :  { %1107 = dma.done.wait [#allocation5], 256  }
 0x153   :  { %1108 = vsyncadd [#allocation5], 4294967040 }
 0x154   :  { %800 = vsyncpa [#allocation4], 1 }
 0x155   :  { %801 = vsyncpa [#allocation7], 1 }
 0x156   :  { %802 = vsyncpa [#allocation5], 1 }

</bundles_post_ra>
